<compile_context>
chip_gen: v7x
topology: tpu7x:2x2x1
jax: 0.10.0
libtpu: 0.0.40
codegen_flags: <defaults>
</compile_context>

<pallas_src>
import math

import jax
import jax.numpy as jnp
from jax.experimental import pallas as pl
from jax.experimental.pallas import tpu as pltpu


def _round_up(v, m):
    return (v + m - 1) // m * m


def _vmem_capacity_bytes():
    """Physical VMEM of the local TPU generation (64 MiB fallback = safe)."""
    try:
        info = pltpu.get_tpu_info()
        cap = getattr(info, "vmem_capacity_bytes", None)
        if cap:
            return int(cap)
    except Exception:
        pass
    return 64 * 1024 * 1024


def _choose_tk(k_pad, max_tk):
    """Largest multiple-of-128 divisor of k_pad that is <= max_tk (>= 128)."""
    q = k_pad // 128
    best = 1
    for d in range(1, min(q, max(max_tk // 128, 1)) + 1):
        if q % d == 0:
            best = d
    return 128 * best


def _make_kernel(tk, a_resident, compute_dtype):
    def kernel(x_ref, a_ref, b_ref, bias_ref, o_ref, acc_ref):
        k = pl.program_id(1)

        @pl.when(k == 0)
        def _init():
            acc_ref[...] = jnp.zeros_like(acc_ref)

        # Cast the streamed (f32) x tile to the MXU dtype in-kernel: the VPU
        # cast is free here and saves a full HBM pre-pass in the wrapper.
        x_tile = x_ref[...].astype(compute_dtype)
        if a_resident:
            start = pl.multiple_of(k * tk, 128)
            a_tile = a_ref[pl.ds(start, tk), :]
        else:
            a_tile = a_ref[...]
        acc_ref[...] += jnp.dot(x_tile, a_tile,
                                preferred_element_type=jnp.float32)

        @pl.when(k == pl.num_programs(1) - 1)
        def _finalize():
            xa = acc_ref[...].astype(compute_dtype)     # lane-dense (tm, R_pad)
            out = jnp.dot(xa, b_ref[...], preferred_element_type=jnp.float32)
            out = out + bias_ref[...]                   # (tm,N)+(1,N) f32 on VPU
            o_ref[...] = out.astype(o_ref.dtype)

    return kernel


def lowrank_forward(x, A, B, bias=None, *, compute_dtype=jnp.bfloat16,
                    out_dtype=None):
    """out = x @ A @ B (+ bias).  x: (..., K), A: (K, R), B: (R, N)."""
    *lead, K = x.shape
    Kr, R = A.shape
    Rr, N = B.shape
    assert K == Kr and R == Rr
    out_dtype = x.dtype if out_dtype is None else out_dtype

    x2 = x.reshape(-1, K)
    M = x2.shape[0]

    x_itemsize = jnp.dtype(x.dtype).itemsize
    out_itemsize = jnp.dtype(out_dtype).itemsize
    cdt_size = jnp.dtype(compute_dtype).itemsize

    # Lane-dense padding of feature dims (zeros do not change the math).
    K_pad = _round_up(K, 128)
    R_pad = _round_up(R, 128)
    N_pad = _round_up(N, 128)

    # Keep A resident in VMEM (fetched exactly once) unless genuinely big.
    a_resident = K_pad * R_pad * cdt_size <= 4 * 1024 * 1024

    # ---- generation-aware tile selection --------------------------------
    vmem_cap = _vmem_capacity_bytes()
    vmem_budget = int(0.6 * vmem_cap)       # headroom for compiler scratch

    tk = _choose_tk(K_pad, 2048)            # big K tiles, exact divisor of K_pad

    m16 = _round_up(max(M, 1), 16)          # bf16 packs 16 rows per sublane group
    cands = [c for c in (512, 256, 128, 64, 32, 16) if c <= m16] or [16]
    tm = None
    for c in cands:                         # biggest tile with <= ~12% row waste
        if _round_up(M, c) - M <= max(M // 8, 0):
            tm = c
            break
    if tm is None:
        tm = min(cands, key=lambda c: _round_up(M, c) - M)
    if m16 >= 512:                          # v7x: >= 2 M tiles so both TCs work
        while tm > 16 and _round_up(M, tm) // tm < 2:
            tm //= 2

    def _a_vmem(tk_):
        return (K_pad * R_pad * cdt_size if a_resident
                else 2 * tk_ * R_pad * cdt_size)

    def _tile_vmem(tm_, tk_):
        return (2 * tm_ * tk_ * x_itemsize          # x, double-buffered
                + 2 * tm_ * N_pad * out_itemsize    # out, double-buffered
                + tm_ * R_pad * 4                   # f32 accumulator
                + _a_vmem(tk_)                      # A (resident or streamed)
                + R_pad * N_pad * cdt_size          # B (single-buffered)
                + N_pad * 4)                        # bias

    # Shrink tm first (the (tm, N_pad) out tile is the usual hog for big N),
    # then tk, until the working set fits the per-generation VMEM budget.
    # NOTE: for very large out_features an N grid axis (and an fp8 operand
    # path on v7x) would be the next step; tm reduction covers fit here.
    while _tile_vmem(tm, tk) > vmem_budget:
        if tm > 64:
            tm //= 2
        elif tk > 256:
            tk = _choose_tk(K_pad, tk // 2)
        elif tm > 16:
            tm //= 2
        elif tk > 128:
            tk = _choose_tk(K_pad, tk // 2)
        else:
            break

    M_pad = _round_up(M, tm)

    # ---- operand preparation --------------------------------------------
    # Fast path: aligned x goes straight to the kernel (no pad/cast HBM pass).
    if M_pad != M or K_pad != K:
        x_in = jnp.pad(x2, ((0, M_pad - M), (0, K_pad - K)))
    else:
        x_in = x2

    # Weights are tiny relative to x: pad + cast eagerly.
    A_p = jnp.pad(A, ((0, K_pad - K), (0, R_pad - R))).astype(compute_dtype)
    B_p = jnp.pad(B, ((0, R_pad - R), (0, N_pad - N))).astype(compute_dtype)
    if bias is None:
        bias_p = jnp.zeros((1, N_pad), jnp.float32)
    else:
        bias_p = jnp.pad(bias.astype(jnp.float32).reshape(1, N),
                         ((0, 0), (0, N_pad - N)))

    grid = (M_pad // tm, K_pad // tk)
    kernel = _make_kernel(tk, a_resident, compute_dtype)

    vmem_limit = int(min(max(2 * _tile_vmem(tm, tk), 32 * 1024 * 1024),
                         int(0.8 * vmem_cap)))

    cost = pl.CostEstimate(
        flops=2 * M * K * R + 2 * M * R * N,
        transcendentals=0,
        bytes_accessed=(x_in.size * x_itemsize
                        + A_p.size * cdt_size + B_p.size * cdt_size
                        + bias_p.size * 4 + M_pad * N_pad * out_itemsize),
    )

    def build(single_buffer_consts):
        def const_spec(shape, imap):
            # Constant-index operand: fetched once; single-buffer to save VMEM.
            if single_buffer_consts:
                return pl.BlockSpec(shape, imap, pipeline_mode=pl.Buffered(1))
            return pl.BlockSpec(shape, imap)

        if a_resident:
            a_spec = const_spec((K_pad, R_pad), lambda i, k: (0, 0))
        else:
            a_spec = pl.BlockSpec((tk, R_pad), lambda i, k: (k, 0))

        return pl.pallas_call(
            kernel,
            out_shape=jax.ShapeDtypeStruct((M_pad, N_pad), out_dtype),
            grid_spec=pltpu.PrefetchScalarGridSpec(
                num_scalar_prefetch=0,
                grid=grid,
                in_specs=[
                    pl.BlockSpec((tm, tk), lambda i, k: (i, k)),     # x (streamed)
                    a_spec,                                          # A
                    const_spec((R_pad, N_pad), lambda i, k: (0, 0)), # B
                    const_spec((1, N_pad), lambda i, k: (0, 0)),     # bias
                ],
                out_specs=pl.BlockSpec((tm, N_pad), lambda i, k: (i, 0)),
                scratch_shapes=[pltpu.VMEM((tm, R_pad), jnp.float32)],
            ),
            compiler_params=pltpu.CompilerParams(
                dimension_semantics=("parallel", "arbitrary"),
                vmem_limit_bytes=vmem_limit,
            ),
            cost_estimate=cost,
        )

    single_buffer = hasattr(pl, "Buffered")
    try:
        out_padded = jax.block_until_ready(
            build(single_buffer)(x_in, A_p, B_p, bias_p))
    except Exception:
        if not single_buffer:
            raise
        # pipeline_mode=Buffered(1) unsupported here: retry with default
        # double-buffering (identical semantics, slightly more VMEM).
        out_padded = jax.block_until_ready(
            build(False)(x_in, A_p, B_p, bias_p))

    out = out_padded
    if M_pad != M or N_pad != N:
        out = out[:M, :N]
    return out.reshape(*lead, N)


def kaiming_uniform(key, shape):
    # torch.nn.init.kaiming_uniform_ defaults: a=0 -> gain=sqrt(2),
    # fan_in = shape[1] for a 2-D tensor (torch convention).
    fan_in = shape[1]
    bound = math.sqrt(2.0) * math.sqrt(3.0 / fan_in)
    return jax.random.uniform(key, shape, jnp.float32, -bound, bound)


if __name__ == "__main__":
    in_features, out_features, rank = 32, 64, 8
    batch = 16

    key = jax.random.PRNGKey(0)
    kx, kA, kB, kb = jax.random.split(key, 4)

    x = jax.random.normal(kx, (batch, in_features), jnp.float32)
    A = kaiming_uniform(kA, (in_features, rank))
    B = kaiming_uniform(kB, (rank, out_features))
    b = jax.random.uniform(kb, (out_features,), jnp.float32, 0.0, 1.0)

    out = lowrank_forward(x, A, B, b)
    out = jax.block_until_ready(out)
    assert out.shape == (batch, out_features)

    # Check 1: parity with the kernel's bf16-operand / f32-accumulate math.
    xb, Ab, Bb = (t.astype(jnp.bfloat16).astype(jnp.float32) for t in (x, A, B))
    ref_bf16 = (xb @ Ab) @ Bb + b
    assert jnp.allclose(out, ref_bf16, atol=5e-2, rtol=1e-2), float(
        jnp.max(jnp.abs(out - ref_bf16)))

    # Check 2: sanity vs. full-f32 module semantics (bf16-appropriate tolerance).
    ref_f32 = x @ A @ B + b
    assert jnp.allclose(out, ref_f32, atol=2e-1, rtol=5e-2), float(
        jnp.max(jnp.abs(out - ref_f32)))

    print("KERNEL_OK")
</pallas_src>

<mosaic_0001>
module attributes {stable_mosaic.version = 11 : i64} {
  func.func @kernel(%arg0: i32, %arg1: i32, %arg2: memref<16x128xf32, #tpu.memory_space<vmem>>, %arg3: memref<128x128xbf16, #tpu.memory_space<vmem>>, %arg4: memref<128x128xbf16, #tpu.memory_space<vmem>>, %arg5: memref<1x128xf32, #tpu.memory_space<vmem>>, %arg6: memref<16x128xf32, #tpu.memory_space<vmem>>, %arg7: memref<16x128xf32, #tpu.memory_space<vmem>>) attributes {dimension_semantics = [#tpu.dimension_semantics<parallel>, #tpu.dimension_semantics<arbitrary>], iteration_bounds = array<i64: 1, 1>, scalar_prefetch = 0 : i64, scratch_operands = 1 : i64, tpu.core_type = #tpu.core_type<tc>, window_params = [{transform_indices = @transform_0, window_bounds = array<i64: 16, 128>}, {pipeline_mode = #tpu.pipeline_mode<synchronous>, transform_indices = @transform_1, window_bounds = array<i64: 128, 128>}, {pipeline_mode = #tpu.pipeline_mode<synchronous>, transform_indices = @transform_2, window_bounds = array<i64: 128, 128>}, {pipeline_mode = #tpu.pipeline_mode<synchronous>, transform_indices = @transform_3, window_bounds = array<i64: 1, 128>}, {transform_indices = @transform_4, window_bounds = array<i64: 16, 128>}]} {
    %c0_i32 = arith.constant 0 : i32
    %0 = arith.cmpi eq, %arg1, %c0_i32 : i32
    %1 = arith.extui %0 : i1 to i32
    %c0_i32_0 = arith.constant 0 : i32
    %2 = arith.cmpi ne, %1, %c0_i32_0 : i32
    scf.if %2 {
      %cst_9 = arith.constant 0.000000e+00 : f32
      %16 = vector.broadcast %cst_9 : f32 to vector<16x128xf32>
      %c0_10 = arith.constant 0 : index
      %c0_11 = arith.constant 0 : index
      %17 = vector.load %arg7[%c0_10, %c0_11] : memref<16x128xf32, #tpu.memory_space<vmem>>, vector<16x128xf32>
      tpu.vector_store %arg7[%c0_10, %c0_11], %16 {strides = array<i32>} : memref<16x128xf32, #tpu.memory_space<vmem>>, vector<16x128xf32>,
    } else {
    }
    %c0 = arith.constant 0 : index
    %c0_1 = arith.constant 0 : index
    %3 = vector.load %arg2[%c0, %c0_1] : memref<16x128xf32, #tpu.memory_space<vmem>>, vector<16x128xf32>
    %4 = arith.truncf %3 : vector<16x128xf32> to vector<16x128xbf16>
    %c128_i32 = arith.constant 128 : i32
    %5 = arith.muli %arg1, %c128_i32 : i32
    %6 = tpu.assume_multiple %5, 128 : i32
    %7 = arith.index_cast %6 : i32 to index
    %c0_2 = arith.constant 0 : index
    %8 = vector.load %arg3[%7, %c0_2] : memref<128x128xbf16, #tpu.memory_space<vmem>>, vector<128x128xbf16>
    %c0_3 = arith.constant 0 : index
    %c0_4 = arith.constant 0 : index
    %9 = vector.load %arg7[%c0_3, %c0_4] : memref<16x128xf32, #tpu.memory_space<vmem>>, vector<16x128xf32>
    %cst = arith.constant dense<0.000000e+00> : vector<16x128xf32>
    %10 = tpu.matmul %4, %8, %cst {dimension_numbers = #tpu.dot_dimension_numbers<[1], [0], [0], [1], [0, 0, 1, 1], [], []>} : vector<16x128xbf16>, vector<128x128xbf16>, vector<16x128xf32> -> vector<16x128xf32>
    %11 = arith.addf %9, %10 : vector<16x128xf32>
    %c0_5 = arith.constant 0 : index
    %c0_6 = arith.constant 0 : index
    %12 = vector.load %arg7[%c0_5, %c0_6] : memref<16x128xf32, #tpu.memory_space<vmem>>, vector<16x128xf32>
    tpu.vector_store %arg7[%c0_5, %c0_6], %11 {strides = array<i32>} : memref<16x128xf32, #tpu.memory_space<vmem>>, vector<16x128xf32>,
    %c0_i32_7 = arith.constant 0 : i32
    %13 = arith.cmpi eq, %arg1, %c0_i32_7 : i32
    %14 = arith.extui %13 : i1 to i32
    %c0_i32_8 = arith.constant 0 : i32
    %15 = arith.cmpi ne, %14, %c0_i32_8 : i32
    scf.if %15 {
      %c0_9 = arith.constant 0 : index
      %c0_10 = arith.constant 0 : index
      %16 = vector.load %arg7[%c0_9, %c0_10] : memref<16x128xf32, #tpu.memory_space<vmem>>, vector<16x128xf32>
      %17 = arith.truncf %16 : vector<16x128xf32> to vector<16x128xbf16>
      %c0_11 = arith.constant 0 : index
      %c0_12 = arith.constant 0 : index
      %18 = vector.load %arg4[%c0_11, %c0_12] : memref<128x128xbf16, #tpu.memory_space<vmem>>, vector<128x128xbf16>
      %cst_13 = arith.constant dense<0.000000e+00> : vector<16x128xf32>
      %19 = tpu.matmul %17, %18, %cst_13 {dimension_numbers = #tpu.dot_dimension_numbers<[1], [0], [0], [1], [0, 0, 1, 1], [], []>} : vector<16x128xbf16>, vector<128x128xbf16>, vector<16x128xf32> -> vector<16x128xf32>
      %c0_14 = arith.constant 0 : index
      %c0_15 = arith.constant 0 : index
      %20 = vector.load %arg5[%c0_14, %c0_15] : memref<1x128xf32, #tpu.memory_space<vmem>>, vector<1x128xf32>
      %21 = vector.broadcast %20 : vector<1x128xf32> to vector<16x128xf32>
      %22 = arith.addf %19, %21 : vector<16x128xf32>
      %c0_16 = arith.constant 0 : index
      %c0_17 = arith.constant 0 : index
      %23 = vector.load %arg6[%c0_16, %c0_17] : memref<16x128xf32, #tpu.memory_space<vmem>>, vector<16x128xf32>
      tpu.vector_store %arg6[%c0_16, %c0_17], %22 {strides = array<i32>} : memref<16x128xf32, #tpu.memory_space<vmem>>, vector<16x128xf32>,
    } else {
    }
    return
  }
  func.func @transform_0(%arg0: i32, %arg1: i32) -> (i32, i32) {
    %c0_i32 = arith.constant 0 : i32
    return %arg0, %arg1 : i32, i32
  }
  func.func @transform_1(%arg0: i32, %arg1: i32) -> (i32, i32) {
    %c0_i32 = arith.constant 0 : i32
    %c0_i32_0 = arith.constant 0 : i32
    %c0_i32_1 = arith.constant 0 : i32
    return %c0_i32, %c0_i32_0 : i32, i32
  }
  func.func @transform_2(%arg0: i32, %arg1: i32) -> (i32, i32) {
    %c0_i32 = arith.constant 0 : i32
    %c0_i32_0 = arith.constant 0 : i32
    %c0_i32_1 = arith.constant 0 : i32
    return %c0_i32, %c0_i32_0 : i32, i32
  }
  func.func @transform_3(%arg0: i32, %arg1: i32) -> (i32, i32) {
    %c0_i32 = arith.constant 0 : i32
    %c0_i32_0 = arith.constant 0 : i32
    %c0_i32_1 = arith.constant 0 : i32
    return %c0_i32, %c0_i32_0 : i32, i32
  }
  func.func @transform_4(%arg0: i32, %arg1: i32) -> (i32, i32) {
    %c0_i32 = arith.constant 0 : i32
    %c0_i32_0 = arith.constant 0 : i32
    return %arg0, %c0_i32 : i32, i32
  }
}

module attributes {stable_mosaic.version = 11 : i64} {
  func.func @kernel(%arg0: i32, %arg1: i32, %arg2: memref<16x128xf32, #tpu.memory_space<vmem>>, %arg3: memref<128x128xbf16, #tpu.memory_space<vmem>>, %arg4: memref<128x128xbf16, #tpu.memory_space<vmem>>, %arg5: memref<1x128xf32, #tpu.memory_space<vmem>>, %arg6: memref<16x128xf32, #tpu.memory_space<vmem>>, %arg7: memref<16x128xf32, #tpu.memory_space<vmem>>) attributes {dimension_semantics = [#tpu.dimension_semantics<parallel>, #tpu.dimension_semantics<arbitrary>], iteration_bounds = array<i64: 1, 1>, scalar_prefetch = 0 : i64, scratch_operands = 1 : i64, tpu.core_type = #tpu.core_type<tc>, window_params = [{transform_indices = @transform_0, window_bounds = array<i64: 16, 128>}, {pipeline_mode = #tpu.pipeline_mode<synchronous>, transform_indices = @transform_1, window_bounds = array<i64: 128, 128>}, {pipeline_mode = #tpu.pipeline_mode<synchronous>, transform_indices = @transform_2, window_bounds = array<i64: 128, 128>}, {pipeline_mode = #tpu.pipeline_mode<synchronous>, transform_indices = @transform_3, window_bounds = array<i64: 1, 128>}, {transform_indices = @transform_4, window_bounds = array<i64: 16, 128>}]} {
    %c0_i32 = arith.constant 0 : i32
    %0 = arith.cmpi eq, %arg1, %c0_i32 : i32
    %1 = arith.extui %0 : i1 to i32
    %c0_i32_0 = arith.constant 0 : i32
    %2 = arith.cmpi ne, %1, %c0_i32_0 : i32
    scf.if %2 {
      %cst_9 = arith.constant 0.000000e+00 : f32
      %16 = vector.broadcast %cst_9 : f32 to vector<16x128xf32>
      %c0_10 = arith.constant 0 : index
      %c0_11 = arith.constant 0 : index
      %17 = vector.load %arg7[%c0_10, %c0_11] : memref<16x128xf32, #tpu.memory_space<vmem>>, vector<16x128xf32>
      tpu.vector_store %arg7[%c0_10, %c0_11], %16 {strides = array<i32>} : memref<16x128xf32, #tpu.memory_space<vmem>>, vector<16x128xf32>,
    } else {
    }
    %c0 = arith.constant 0 : index
    %c0_1 = arith.constant 0 : index
    %3 = vector.load %arg2[%c0, %c0_1] : memref<16x128xf32, #tpu.memory_space<vmem>>, vector<16x128xf32>
    %4 = arith.truncf %3 : vector<16x128xf32> to vector<16x128xbf16>
    %c128_i32 = arith.constant 128 : i32
    %5 = arith.muli %arg1, %c128_i32 : i32
    %6 = tpu.assume_multiple %5, 128 : i32
    %7 = arith.index_cast %6 : i32 to index
    %c0_2 = arith.constant 0 : index
    %8 = vector.load %arg3[%7, %c0_2] : memref<128x128xbf16, #tpu.memory_space<vmem>>, vector<128x128xbf16>
    %c0_3 = arith.constant 0 : index
    %c0_4 = arith.constant 0 : index
    %9 = vector.load %arg7[%c0_3, %c0_4] : memref<16x128xf32, #tpu.memory_space<vmem>>, vector<16x128xf32>
    %cst = arith.constant dense<0.000000e+00> : vector<16x128xf32>
    %10 = tpu.matmul %4, %8, %cst {dimension_numbers = #tpu.dot_dimension_numbers<[1], [0], [0], [1], [0, 0, 1, 1], [], []>} : vector<16x128xbf16>, vector<128x128xbf16>, vector<16x128xf32> -> vector<16x128xf32>
    %11 = arith.addf %9, %10 : vector<16x128xf32>
    %c0_5 = arith.constant 0 : index
    %c0_6 = arith.constant 0 : index
    %12 = vector.load %arg7[%c0_5, %c0_6] : memref<16x128xf32, #tpu.memory_space<vmem>>, vector<16x128xf32>
    tpu.vector_store %arg7[%c0_5, %c0_6], %11 {strides = array<i32>} : memref<16x128xf32, #tpu.memory_space<vmem>>, vector<16x128xf32>,
    %c0_i32_7 = arith.constant 0 : i32
    %13 = arith.cmpi eq, %arg1, %c0_i32_7 : i32
    %14 = arith.extui %13 : i1 to i32
    %c0_i32_8 = arith.constant 0 : i32
    %15 = arith.cmpi ne, %14, %c0_i32_8 : i32
    scf.if %15 {
      %c0_9 = arith.constant 0 : index
      %c0_10 = arith.constant 0 : index
      %16 = vector.load %arg7[%c0_9, %c0_10] : memref<16x128xf32, #tpu.memory_space<vmem>>, vector<16x128xf32>
      %17 = arith.truncf %16 : vector<16x128xf32> to vector<16x128xbf16>
      %c0_11 = arith.constant 0 : index
      %c0_12 = arith.constant 0 : index
      %18 = vector.load %arg4[%c0_11, %c0_12] : memref<128x128xbf16, #tpu.memory_space<vmem>>, vector<128x128xbf16>
      %cst_13 = arith.constant dense<0.000000e+00> : vector<16x128xf32>
      %19 = tpu.matmul %17, %18, %cst_13 {dimension_numbers = #tpu.dot_dimension_numbers<[1], [0], [0], [1], [0, 0, 1, 1], [], []>} : vector<16x128xbf16>, vector<128x128xbf16>, vector<16x128xf32> -> vector<16x128xf32>
      %c0_14 = arith.constant 0 : index
      %c0_15 = arith.constant 0 : index
      %20 = vector.load %arg5[%c0_14, %c0_15] : memref<1x128xf32, #tpu.memory_space<vmem>>, vector<1x128xf32>
      %21 = vector.broadcast %20 : vector<1x128xf32> to vector<16x128xf32>
      %22 = arith.addf %19, %21 : vector<16x128xf32>
      %c0_16 = arith.constant 0 : index
      %c0_17 = arith.constant 0 : index
      %23 = vector.load %arg6[%c0_16, %c0_17] : memref<16x128xf32, #tpu.memory_space<vmem>>, vector<16x128xf32>
      tpu.vector_store %arg6[%c0_16, %c0_17], %22 {strides = array<i32>} : memref<16x128xf32, #tpu.memory_space<vmem>>, vector<16x128xf32>,
    } else {
    }
    return
  }
  func.func @transform_0(%arg0: i32, %arg1: i32) -> (i32, i32) {
    %c0_i32 = arith.constant 0 : i32
    return %arg0, %arg1 : i32, i32
  }
  func.func @transform_1(%arg0: i32, %arg1: i32) -> (i32, i32) {
    %c0_i32 = arith.constant 0 : i32
    %c0_i32_0 = arith.constant 0 : i32
    %c0_i32_1 = arith.constant 0 : i32
    return %c0_i32, %c0_i32_0 : i32, i32
  }
  func.func @transform_2(%arg0: i32, %arg1: i32) -> (i32, i32) {
    %c0_i32 = arith.constant 0 : i32
    %c0_i32_0 = arith.constant 0 : i32
    %c0_i32_1 = arith.constant 0 : i32
    return %c0_i32, %c0_i32_0 : i32, i32
  }
  func.func @transform_3(%arg0: i32, %arg1: i32) -> (i32, i32) {
    %c0_i32 = arith.constant 0 : i32
    %c0_i32_0 = arith.constant 0 : i32
    %c0_i32_1 = arith.constant 0 : i32
    return %c0_i32, %c0_i32_0 : i32, i32
  }
  func.func @transform_4(%arg0: i32, %arg1: i32) -> (i32, i32) {
    %c0_i32 = arith.constant 0 : i32
    %c0_i32_0 = arith.constant 0 : i32
    return %arg0, %c0_i32 : i32, i32
  }
}

</mosaic_0001>

<bundles_post_ra>
// kernel: tpu_custom_call.1
= control target key start
LH: loop header
LB: loop body
LE: loop exit
PB: predicated region body
PF: predicated region fallthrough
CT: control target
= control target key end

     0   :  { %9 = vsyncpa [#allocation4], 0  ;;  %s618_s0 = inlined_call_operand.hbm [shape: f32[16,128], index: 0, kind: input, shape index: {}]   ;;  %s619_s1 = inlined_call_operand.hbm [shape: bf16[128,128], index: 1, kind: input, shape index: {}]   ;;  %s620_s2 = inlined_call_operand.hbm [shape: bf16[128,128], index: 2, kind: input, shape index: {}]   ;;  %s621_s3 = inlined_call_operand.vmem [shape: f32[1,128], index: 3, kind: input, shape index: {}]   ;;  %s622_s4 = inlined_call_operand.hbm [shape: f32[16,128], index: 4, kind: output, shape index: {}]  }
   0x1   :  { %10 = vsyncpa [#allocation7], 0 }
   0x2   :  { %11 = vsyncpa [#allocation5], 0  ;;  %s520_s15 = smov [#allocation6]   ;;  %s426_s19 = scalar_lea.hbm %s619_s1, 1024 }
   0x3   :  { %s29_s16 = sshll.u32 %s520_s15, 4  ;;  %p427_p0 = scmp.ne.s32.totalorder %s619_s1, %s426_s19  ;;  %s30_s16 = int_to_ptr.vmem [resolvable:$true] %s29_s16 }
   0x4   :  { %p430_p1 = scmp.lt.u32.totalorder %s426_s19, %s619_s1 }
   0x6   :  { %p432_p2 = pnand %p430_p1, %p427_p0 }
   0x8   :  { %435 = shalt.err (!%p432_p2)
}
   0x9   :  { %s436_s24 = scalar_lea.vmem %s30_s16, 1024  ;;  %p441_p4 = scmp.lt.s32.totalorder %s30_s16, %s30_s16 }
   0xa   :  { %p437_p3 = scmp.ne.s32.totalorder %s30_s16, %s436_s24  ;;  %p442_p5 = scmp.lt.s32.totalorder %s436_s24, %s436_s24 }
   0xc   :  { %p443_p6 = por %p442_p5, %p441_p4 }
   0xe   :  { %p444_p7 = pnand %p443_p6, %p437_p3 }
  0x10   :  { %447 = shalt.err (!%p444_p7)
}
  0x11   :  { %s521_s25 = smov 64   ;;  %s522_s26 = smov 4  }
  0x12   :  { %35 = dma.hbm_to_vmem [thread:$0]  %s619_s1, 1024, %s30_s16, [#allocation7], %s521_s25, %s521_s25, %s522_s26  }
  0x13   :  { %s523_s29 = smov [#allocation3]   ;;  %s448_s7 = scalar_lea.hbm %s618_s0, 256 }
  0x14   :  { %s17_s30 = sshll.u32 %s523_s29, 4  ;;  %p449_p8 = scmp.ne.s32.totalorder %s618_s0, %s448_s7  ;;  %s18_s30 = int_to_ptr.vmem [resolvable:$true] %s17_s30 }
  0x15   :  { %p452_p9 = scmp.lt.u32.totalorder %s448_s7, %s618_s0 }
  0x17   :  { %p454_p10 = pnand %p452_p9, %p449_p8 }
  0x19   :  { %457 = shalt.err (!%p454_p10)
}
  0x1a   :  { %s458_s12 = scalar_lea.vmem %s18_s30, 256  ;;  %p463_p12 = scmp.lt.s32.totalorder %s18_s30, %s18_s30 }
  0x1b   :  { %p459_p11 = scmp.ne.s32.totalorder %s18_s30, %s458_s12  ;;  %p464_p13 = scmp.lt.s32.totalorder %s458_s12, %s458_s12 }
  0x1d   :  { %p465_p0 = por %p464_p13, %p463_p12 }
  0x1f   :  { %p466_p1 = pnand %p465_p0, %p459_p11 }
  0x21   :  { %469 = shalt.err (!%p466_p1)
}
  0x22   :  { %s524_s1 = smov 128   ;;  %s525_s13 = smov 8  }
  0x23   :  { %23 = dma.hbm_to_vmem [thread:$0]  %s618_s0, 256, %s18_s30, [#allocation4], %s524_s1, %s524_s1, %s525_s13  }
  0x24   :  { %s526_s16 = smov [#allocation8]   ;;  %s470_s20 = scalar_lea.hbm %s620_s2, 1024 }
  0x25   :  { %s41_s17 = sshll.u32 %s526_s16, 4  ;;  %p471_p2 = scmp.ne.s32.totalorder %s620_s2, %s470_s20  ;;  %s42_s17 = int_to_ptr.vmem [resolvable:$true] %s41_s17 }
  0x26   :  { %p474_p3 = scmp.lt.u32.totalorder %s470_s20, %s620_s2 }
  0x28   :  { %p476_p4 = pnand %p474_p3, %p471_p2 }
  0x2a   :  { %479 = shalt.err (!%p476_p4)
}
  0x2b   :  { %s480_s27 = scalar_lea.vmem %s42_s17, 1024  ;;  %p485_p6 = scmp.lt.s32.totalorder %s42_s17, %s42_s17 }
  0x2c   :  { %p481_p5 = scmp.ne.s32.totalorder %s42_s17, %s480_s27  ;;  %p486_p7 = scmp.lt.s32.totalorder %s480_s27, %s480_s27 }
  0x2e   :  { %p487_p8 = por %p486_p7, %p485_p6 }
  0x30   :  { %p488_p9 = pnand %p487_p8, %p481_p5 }
  0x32   :  { %491 = shalt.err (!%p488_p9)
}
  0x33   :  { %47 = dma.hbm_to_vmem [thread:$0]  %s620_s2, 1024, %s42_s17, [#allocation7], %s521_s25, %s521_s25, %s522_s26  }
  0x34   :  { %514 = dma.done.wait [#allocation4], 256  }
  0x35   :  { %515 = vsyncadd [#allocation4], 4294967040 }
  0x36   :  { %516 = dma.done.wait [#allocation7], 2048  }
  0x37   :  { %517 = vsyncadd [#allocation7], 4294965248  ;;  %v527_v0 = vmov 0.0   ;;  %vm528_vm0 = vmmov 0   ;;  %v410_v1 = vld [vmem:[#allocation6] sm:$0xff]   ;;  %v411_v2 = vld [vmem:[#allocation6 + $0x8] sm:$0xff]  }
  0x38   :  { %360 = vmatprep.subr.bf16.mxu0 %v527_v0  ;;  %376 = vmatprep.mubr.msk.bf16.mxu0 %vm528_vm0, %v527_v0  ;;  %v412_v3 = vld [vmem:[#allocation6 + $0x10] sm:$0xff]   ;;  %v418_v4 = vld [vmem:[#allocation8] sm:$0xff]   ;;  %v413_v5 = vld [vmem:[#allocation6 + $0x18] sm:$0xff]   ;;  %s529_s26 = smov [#allocation9]  }
  0x39   :  { %380 = vmatprep.subr.bf16.mxu1 %v527_v0  ;;  %396 = vmatprep.mubr.msk.bf16.mxu1 %vm528_vm0, %v527_v0  ;;  %v419_v6 = vld [vmem:[#allocation8 + $0x8] sm:$0xff]   ;;  %v414_v7 = vld [vmem:[#allocation6 + $0x20] sm:$0xff]   ;;  %v420_v8 = vld [vmem:[#allocation8 + $0x10] sm:$0xff]   ;;  %s310_s29 = sshll.u32 %s529_s26, 4  ;;  %s311_s29 = int_to_ptr.vmem [resolvable:$true] %s310_s29 }
  0x3a   :  { %361 = vmatpush3.bf16.msra.mxu0 %v410_v1  ;;  %381 = vmatpush3.bf16.msra.mxu1 %v418_v4  ;;  %v415_v9 = vld [vmem:[#allocation6 + $0x28] sm:$0xff]   ;;  %v421_v10 = vld [vmem:[#allocation8 + $0x18] sm:$0xff]   ;;  %v416_v11 = vld [vmem:[#allocation6 + $0x30] sm:$0xff]   ;;  %s492_s30 = scalar_lea.vmem %s311_s29, 256  ;;  %p497_p11 = scmp.lt.s32.totalorder %s311_s29, %s311_s29 }
  0x3b   :  { %362 = vmatprep.subr.bf16.mxu0 %v527_v0  ;;  %382 = vmatprep.subr.bf16.mxu1 %v527_v0  ;;  %v422_v12 = vld [vmem:[#allocation8 + $0x20] sm:$0xff]   ;;  %v417_v13 = vld [vmem:[#allocation6 + $0x38] sm:$0xff]   ;;  %v66_v14 = vld [vmem:[#allocation3] sm:$0xff]  ;;  %p493_p10 = scmp.ne.s32.totalorder %s311_s29, %s492_s30  ;;  %p498_p12 = scmp.lt.s32.totalorder %s492_s30, %s492_s30 }
  0x3c   :  { %v67_v15 = vld [vmem:[#allocation3 + $0x8] sm:$0xff]  ;;  %v423_v16 = vld [vmem:[#allocation8 + $0x28] sm:$0xff]   ;;  %v424_v18 = vld [vmem:[#allocation8 + $0x30] sm:$0xff]  }
  0x3d   :  { %v68_v17 = vpack.c.bf16 %v67_v15, %v66_v14  ;;  %v425_v19 = vld [vmem:[#allocation8 + $0x38] sm:$0xff]   ;;  %v333_v25 = vld [vmem:[%s621_s3] ss:$0 sm:$0xff]  ;;  %p499_p13 = por %p498_p12, %p497_p11 }
  0x3e   :  { %363 = vmatpush3.bf16.msra.mxu0 %v411_v2  ;;  %383 = vmatpush3.bf16.msra.mxu1 %v419_v6 }
  0x3f   :  { %364 = vmatprep.subr.bf16.mxu0 %v527_v0  ;;  %384 = vmatprep.subr.bf16.mxu1 %v527_v0  ;;  %p500_p0 = pnand %p499_p13, %p493_p10 }
  0x42   :  { %365 = vmatpush3.bf16.msra.mxu0 %v412_v3  ;;  %385 = vmatpush3.bf16.msra.mxu1 %v420_v8 }
  0x43   :  { %366 = vmatprep.subr.bf16.mxu0 %v527_v0  ;;  %386 = vmatprep.subr.bf16.mxu1 %v527_v0 }
  0x46   :  { %367 = vmatpush3.bf16.msra.mxu0 %v413_v5  ;;  %387 = vmatpush3.bf16.msra.mxu1 %v421_v10 }
  0x47   :  { %368 = vmatprep.subr.bf16.mxu0 %v527_v0  ;;  %388 = vmatprep.subr.bf16.mxu1 %v527_v0 }
  0x4a   :  { %369 = vmatpush3.bf16.msra.mxu0 %v414_v7  ;;  %389 = vmatpush3.bf16.msra.mxu1 %v422_v12 }
  0x4b   :  { %370 = vmatprep.subr.bf16.mxu0 %v527_v0  ;;  %390 = vmatprep.subr.bf16.mxu1 %v527_v0 }
  0x4e   :  { %371 = vmatpush3.bf16.msra.mxu0 %v415_v9  ;;  %391 = vmatpush3.bf16.msra.mxu1 %v423_v16 }
  0x4f   :  { %372 = vmatprep.subr.bf16.mxu0 %v527_v0  ;;  %392 = vmatprep.subr.bf16.mxu1 %v527_v0 }
  0x52   :  { %373 = vmatpush3.bf16.msra.mxu0 %v416_v11  ;;  %393 = vmatpush3.bf16.msra.mxu1 %v424_v18 }
  0x53   :  { %374 = vmatprep.subr.bf16.mxu0 %v527_v0  ;;  %394 = vmatprep.subr.bf16.mxu1 %v527_v0 }
  0x56   :  { %375 = vmatpush3.bf16.msra.mxu0 %v417_v13  ;;  %395 = vmatpush3.bf16.msra.mxu1 %v425_v19 }
  0x59   :  { %377 = vmatmul.mubr.bf16.vlgmr.msra.gmra.mrb[0].mxu0 %v68_v17 }
 0x12c   :  { %v174_v20 = vpop.f32.mrb[0].mxu0 }
 0x12d   :  { %v378_v21 = vpop.f32.mrb[1].mxu0 }
 0x12e   :  { %v177_v22 = vpop.f32.mrb[2].mxu0 }
 0x12f   :  { %v190_v23 = vpack.c.bf16 %v177_v22, %v174_v20  ;;  %v379_v24 = vpop.f32.mrb[3].mxu0 }
 0x131   :  { %397 = vmatmul.mubr.bf16.vlgmr.msra.gmra.mrb[0].mxu1 %v190_v23 }
 0x204   :  { %v296_v26 = vpop.f32.mrb[0].mxu1 }
 0x205   :  { %v297_v27 = vadd.f32 %v333_v25, %v296_v26  ;;  %v398_v28 = vpop.f32.mrb[1].mxu1 }
 0x206   :  { %v299_v29 = vpop.f32.mrb[2].mxu1 }
 0x207   :  { %303 = vst [vmem:[#allocation9] sm:$0xff] %v297_v27  ;;  %v300_v30 = vadd.f32 %v333_v25, %v299_v29  ;;  %v399_v31 = vpop.f32.mrb[3].mxu1 }
 0x209   :  { %304 = vst [vmem:[#allocation9 + $0x8] sm:$0xff] %v300_v30 }
 0x20a   :  { %503 = shalt.err (!%p500_p0)
}
 0x20b   :  { %s504_s6 = scalar_lea.hbm %s622_s4, 256 }
 0x20c   :  { %p505_p1 = scmp.ne.s32.totalorder %s622_s4, %s504_s6  ;;  %p508_p2 = scmp.lt.u32.totalorder %s504_s6, %s622_s4 }
 0x20e   :  { %p510_p3 = pnand %p508_p2, %p505_p1 }
 0x210   :  { %513 = shalt.err (!%p510_p3)
}
 0x211   :  { %316 = dma.vmem_to_hbm [thread:$0]  %s311_s29, 256, %s622_s4, [#allocation5], %s524_s1, %s524_s1, %s525_s13  }
 0x212   :  { %518 = dma.done.wait [#allocation5], 256  }
 0x213   :  { %519 = vsyncadd [#allocation5], 4294967040 }
 0x214   :  { %320 = vsyncpa [#allocation4], 1 }
 0x215   :  { %321 = vsyncpa [#allocation7], 1 }
 0x216   :  { %322 = vsyncpa [#allocation5], 1 }

// kernel: tpu_custom_call.1
= control target key start
LH: loop header
LB: loop body
LE: loop exit
PB: predicated region body
PF: predicated region fallthrough
CT: control target
= control target key end

     0   :  { %9 = vsyncpa [#allocation4], 0  ;;  %s618_s0 = inlined_call_operand.hbm [shape: f32[16,128], index: 0, kind: input, shape index: {}]   ;;  %s619_s1 = inlined_call_operand.hbm [shape: bf16[128,128], index: 1, kind: input, shape index: {}]   ;;  %s620_s2 = inlined_call_operand.hbm [shape: bf16[128,128], index: 2, kind: input, shape index: {}]   ;;  %s621_s3 = inlined_call_operand.vmem [shape: f32[1,128], index: 3, kind: input, shape index: {}]   ;;  %s622_s4 = inlined_call_operand.hbm [shape: f32[16,128], index: 4, kind: output, shape index: {}]  }
   0x1   :  { %10 = vsyncpa [#allocation7], 0 }
   0x2   :  { %11 = vsyncpa [#allocation5], 0  ;;  %s520_s15 = smov [#allocation6]   ;;  %s426_s19 = scalar_lea.hbm %s619_s1, 1024 }
   0x3   :  { %s29_s16 = sshll.u32 %s520_s15, 4  ;;  %p427_p0 = scmp.ne.s32.totalorder %s619_s1, %s426_s19  ;;  %s30_s16 = int_to_ptr.vmem [resolvable:$true] %s29_s16 }
   0x4   :  { %p430_p1 = scmp.lt.u32.totalorder %s426_s19, %s619_s1 }
   0x6   :  { %p432_p2 = pnand %p430_p1, %p427_p0 }
   0x8   :  { %435 = shalt.err (!%p432_p2)
}
   0x9   :  { %s436_s24 = scalar_lea.vmem %s30_s16, 1024  ;;  %p441_p4 = scmp.lt.s32.totalorder %s30_s16, %s30_s16 }
   0xa   :  { %p437_p3 = scmp.ne.s32.totalorder %s30_s16, %s436_s24  ;;  %p442_p5 = scmp.lt.s32.totalorder %s436_s24, %s436_s24 }
   0xc   :  { %p443_p6 = por %p442_p5, %p441_p4 }
   0xe   :  { %p444_p7 = pnand %p443_p6, %p437_p3 }
  0x10   :  { %447 = shalt.err (!%p444_p7)
}
  0x11   :  { %s521_s25 = smov 64   ;;  %s522_s26 = smov 4  }
  0x12   :  { %35 = dma.hbm_to_vmem [thread:$0]  %s619_s1, 1024, %s30_s16, [#allocation7], %s521_s25, %s521_s25, %s522_s26  }
  0x13   :  { %s523_s29 = smov [#allocation3]   ;;  %s448_s7 = scalar_lea.hbm %s618_s0, 256 }
  0x14   :  { %s17_s30 = sshll.u32 %s523_s29, 4  ;;  %p449_p8 = scmp.ne.s32.totalorder %s618_s0, %s448_s7  ;;  %s18_s30 = int_to_ptr.vmem [resolvable:$true] %s17_s30 }
  0x15   :  { %p452_p9 = scmp.lt.u32.totalorder %s448_s7, %s618_s0 }
  0x17   :  { %p454_p10 = pnand %p452_p9, %p449_p8 }
  0x19   :  { %457 = shalt.err (!%p454_p10)
}
  0x1a   :  { %s458_s12 = scalar_lea.vmem %s18_s30, 256  ;;  %p463_p12 = scmp.lt.s32.totalorder %s18_s30, %s18_s30 }
  0x1b   :  { %p459_p11 = scmp.ne.s32.totalorder %s18_s30, %s458_s12  ;;  %p464_p13 = scmp.lt.s32.totalorder %s458_s12, %s458_s12 }
  0x1d   :  { %p465_p0 = por %p464_p13, %p463_p12 }
  0x1f   :  { %p466_p1 = pnand %p465_p0, %p459_p11 }
  0x21   :  { %469 = shalt.err (!%p466_p1)
}
  0x22   :  { %s524_s1 = smov 128   ;;  %s525_s13 = smov 8  }
  0x23   :  { %23 = dma.hbm_to_vmem [thread:$0]  %s618_s0, 256, %s18_s30, [#allocation4], %s524_s1, %s524_s1, %s525_s13  }
  0x24   :  { %s526_s16 = smov [#allocation8]   ;;  %s470_s20 = scalar_lea.hbm %s620_s2, 1024 }
  0x25   :  { %s41_s17 = sshll.u32 %s526_s16, 4  ;;  %p471_p2 = scmp.ne.s32.totalorder %s620_s2, %s470_s20  ;;  %s42_s17 = int_to_ptr.vmem [resolvable:$true] %s41_s17 }
  0x26   :  { %p474_p3 = scmp.lt.u32.totalorder %s470_s20, %s620_s2 }
  0x28   :  { %p476_p4 = pnand %p474_p3, %p471_p2 }
  0x2a   :  { %479 = shalt.err (!%p476_p4)
}
  0x2b   :  { %s480_s27 = scalar_lea.vmem %s42_s17, 1024  ;;  %p485_p6 = scmp.lt.s32.totalorder %s42_s17, %s42_s17 }
  0x2c   :  { %p481_p5 = scmp.ne.s32.totalorder %s42_s17, %s480_s27  ;;  %p486_p7 = scmp.lt.s32.totalorder %s480_s27, %s480_s27 }
  0x2e   :  { %p487_p8 = por %p486_p7, %p485_p6 }
  0x30   :  { %p488_p9 = pnand %p487_p8, %p481_p5 }
  0x32   :  { %491 = shalt.err (!%p488_p9)
}
  0x33   :  { %47 = dma.hbm_to_vmem [thread:$0]  %s620_s2, 1024, %s42_s17, [#allocation7], %s521_s25, %s521_s25, %s522_s26  }
  0x34   :  { %514 = dma.done.wait [#allocation4], 256  }
  0x35   :  { %515 = vsyncadd [#allocation4], 4294967040 }
  0x36   :  { %516 = dma.done.wait [#allocation7], 2048  }
  0x37   :  { %517 = vsyncadd [#allocation7], 4294965248  ;;  %v527_v0 = vmov 0.0   ;;  %vm528_vm0 = vmmov 0   ;;  %v410_v1 = vld [vmem:[#allocation6] sm:$0xff]   ;;  %v411_v2 = vld [vmem:[#allocation6 + $0x8] sm:$0xff]  }
  0x38   :  { %360 = vmatprep.subr.bf16.mxu0 %v527_v0  ;;  %376 = vmatprep.mubr.msk.bf16.mxu0 %vm528_vm0, %v527_v0  ;;  %v412_v3 = vld [vmem:[#allocation6 + $0x10] sm:$0xff]   ;;  %v418_v4 = vld [vmem:[#allocation8] sm:$0xff]   ;;  %v413_v5 = vld [vmem:[#allocation6 + $0x18] sm:$0xff]   ;;  %s529_s26 = smov [#allocation9]  }
  0x39   :  { %380 = vmatprep.subr.bf16.mxu1 %v527_v0  ;;  %396 = vmatprep.mubr.msk.bf16.mxu1 %vm528_vm0, %v527_v0  ;;  %v419_v6 = vld [vmem:[#allocation8 + $0x8] sm:$0xff]   ;;  %v414_v7 = vld [vmem:[#allocation6 + $0x20] sm:$0xff]   ;;  %v420_v8 = vld [vmem:[#allocation8 + $0x10] sm:$0xff]   ;;  %s310_s29 = sshll.u32 %s529_s26, 4  ;;  %s311_s29 = int_to_ptr.vmem [resolvable:$true] %s310_s29 }
  0x3a   :  { %361 = vmatpush3.bf16.msra.mxu0 %v410_v1  ;;  %381 = vmatpush3.bf16.msra.mxu1 %v418_v4  ;;  %v415_v9 = vld [vmem:[#allocation6 + $0x28] sm:$0xff]   ;;  %v421_v10 = vld [vmem:[#allocation8 + $0x18] sm:$0xff]   ;;  %v416_v11 = vld [vmem:[#allocation6 + $0x30] sm:$0xff]   ;;  %s492_s30 = scalar_lea.vmem %s311_s29, 256  ;;  %p497_p11 = scmp.lt.s32.totalorder %s311_s29, %s311_s29 }
  0x3b   :  { %362 = vmatprep.subr.bf16.mxu0 %v527_v0  ;;  %382 = vmatprep.subr.bf16.mxu1 %v527_v0  ;;  %v422_v12 = vld [vmem:[#allocation8 + $0x20] sm:$0xff]   ;;  %v417_v13 = vld [vmem:[#allocation6 + $0x38] sm:$0xff]   ;;  %v66_v14 = vld [vmem:[#allocation3] sm:$0xff]  ;;  %p493_p10 = scmp.ne.s32.totalorder %s311_s29, %s492_s30  ;;  %p498_p12 = scmp.lt.s32.totalorder %s492_s30, %s492_s30 }
  0x3c   :  { %v67_v15 = vld [vmem:[#allocation3 + $0x8] sm:$0xff]  ;;  %v423_v16 = vld [vmem:[#allocation8 + $0x28] sm:$0xff]   ;;  %v424_v18 = vld [vmem:[#allocation8 + $0x30] sm:$0xff]  }
  0x3d   :  { %v68_v17 = vpack.c.bf16 %v67_v15, %v66_v14  ;;  %v425_v19 = vld [vmem:[#allocation8 + $0x38] sm:$0xff]   ;;  %v333_v25 = vld [vmem:[%s621_s3] ss:$0 sm:$0xff]  ;;  %p499_p13 = por %p498_p12, %p497_p11 }
  0x3e   :  { %363 = vmatpush3.bf16.msra.mxu0 %v411_v2  ;;  %383 = vmatpush3.bf16.msra.mxu1 %v419_v6 }
  0x3f   :  { %364 = vmatprep.subr.bf16.mxu0 %v527_v0  ;;  %384 = vmatprep.subr.bf16.mxu1 %v527_v0  ;;  %p500_p0 = pnand %p499_p13, %p493_p10 }
  0x42   :  { %365 = vmatpush3.bf16.msra.mxu0 %v412_v3  ;;  %385 = vmatpush3.bf16.msra.mxu1 %v420_v8 }
  0x43   :  { %366 = vmatprep.subr.bf16.mxu0 %v527_v0  ;;  %386 = vmatprep.subr.bf16.mxu1 %v527_v0 }
  0x46   :  { %367 = vmatpush3.bf16.msra.mxu0 %v413_v5  ;;  %387 = vmatpush3.bf16.msra.mxu1 %v421_v10 }
  0x47   :  { %368 = vmatprep.subr.bf16.mxu0 %v527_v0  ;;  %388 = vmatprep.subr.bf16.mxu1 %v527_v0 }
  0x4a   :  { %369 = vmatpush3.bf16.msra.mxu0 %v414_v7  ;;  %389 = vmatpush3.bf16.msra.mxu1 %v422_v12 }
  0x4b   :  { %370 = vmatprep.subr.bf16.mxu0 %v527_v0  ;;  %390 = vmatprep.subr.bf16.mxu1 %v527_v0 }
  0x4e   :  { %371 = vmatpush3.bf16.msra.mxu0 %v415_v9  ;;  %391 = vmatpush3.bf16.msra.mxu1 %v423_v16 }
  0x4f   :  { %372 = vmatprep.subr.bf16.mxu0 %v527_v0  ;;  %392 = vmatprep.subr.bf16.mxu1 %v527_v0 }
  0x52   :  { %373 = vmatpush3.bf16.msra.mxu0 %v416_v11  ;;  %393 = vmatpush3.bf16.msra.mxu1 %v424_v18 }
  0x53   :  { %374 = vmatprep.subr.bf16.mxu0 %v527_v0  ;;  %394 = vmatprep.subr.bf16.mxu1 %v527_v0 }
  0x56   :  { %375 = vmatpush3.bf16.msra.mxu0 %v417_v13  ;;  %395 = vmatpush3.bf16.msra.mxu1 %v425_v19 }
  0x59   :  { %377 = vmatmul.mubr.bf16.vlgmr.msra.gmra.mrb[0].mxu0 %v68_v17 }
 0x12c   :  { %v174_v20 = vpop.f32.mrb[0].mxu0 }
 0x12d   :  { %v378_v21 = vpop.f32.mrb[1].mxu0 }
 0x12e   :  { %v177_v22 = vpop.f32.mrb[2].mxu0 }
 0x12f   :  { %v190_v23 = vpack.c.bf16 %v177_v22, %v174_v20  ;;  %v379_v24 = vpop.f32.mrb[3].mxu0 }
 0x131   :  { %397 = vmatmul.mubr.bf16.vlgmr.msra.gmra.mrb[0].mxu1 %v190_v23 }
 0x204   :  { %v296_v26 = vpop.f32.mrb[0].mxu1 }
 0x205   :  { %v297_v27 = vadd.f32 %v333_v25, %v296_v26  ;;  %v398_v28 = vpop.f32.mrb[1].mxu1 }
 0x206   :  { %v299_v29 = vpop.f32.mrb[2].mxu1 }
 0x207   :  { %303 = vst [vmem:[#allocation9] sm:$0xff] %v297_v27  ;;  %v300_v30 = vadd.f32 %v333_v25, %v299_v29  ;;  %v399_v31 = vpop.f32.mrb[3].mxu1 }
 0x209   :  { %304 = vst [vmem:[#allocation9 + $0x8] sm:$0xff] %v300_v30 }
 0x20a   :  { %503 = shalt.err (!%p500_p0)
}
 0x20b   :  { %s504_s6 = scalar_lea.hbm %s622_s4, 256 }
 0x20c   :  { %p505_p1 = scmp.ne.s32.totalorder %s622_s4, %s504_s6  ;;  %p508_p2 = scmp.lt.u32.totalorder %s504_s6, %s622_s4 }
 0x20e   :  { %p510_p3 = pnand %p508_p2, %p505_p1 }
 0x210   :  { %513 = shalt.err (!%p510_p3)
}
 0x211   :  { %316 = dma.vmem_to_hbm [thread:$0]  %s311_s29, 256, %s622_s4, [#allocation5], %s524_s1, %s524_s1, %s525_s13  }
 0x212   :  { %518 = dma.done.wait [#allocation5], 256  }
 0x213   :  { %519 = vsyncadd [#allocation5], 4294967040 }
 0x214   :  { %320 = vsyncpa [#allocation4], 1 }
 0x215   :  { %321 = vsyncpa [#allocation7], 1 }
 0x216   :  { %322 = vsyncpa [#allocation5], 1 }

</bundles_post_ra>
